<compile_context>
chip_gen: v6e
topology: v6e:2x2x1
jax: 0.10.0
libtpu: 0.0.40
codegen_flags: <defaults>
</compile_context>

<pallas_src>
import functools
import math

import jax
import jax.numpy as jnp
import numpy as np
from jax.experimental import pallas as pl
from jax.experimental.pallas import tpu as pltpu


def _round_up(a, b):
    return ((a + b - 1) // b) * b


# ---------------------------------------------------------------------------
# Pallas kernel: out[:, :half] = sin((scale*x)*freqs), out[:, half:] = cos(...)
# ---------------------------------------------------------------------------
def _sinus_kernel(x_ref, out_ref, *, scale, neg_emb, half):
    # x_ref:   (tb, 1)    float32 timesteps
    # out_ref: (tb, dim)  output dtype; dim == 2*half
    #
    # freqs[j] = exp(j * -(log(10000)/(half-1))); regenerated per grid step on
    # the EUP (cheap: `half` exps vs. tb*half sin/cos of real work).
    idx = jax.lax.broadcasted_iota(jnp.int32, (1, half), 1).astype(jnp.float32)
    freqs = jnp.exp(idx * neg_emb)                        # (1, half)
    # Keep PyTorch's association: (scale * x) * freqs.
    arg = (scale * x_ref[...]) * freqs                    # (tb, half) broadcast mul
    out_ref[:, :half] = jnp.sin(arg).astype(out_ref.dtype)
    out_ref[:, half:] = jnp.cos(arg).astype(out_ref.dtype)
    # TODO(synk): if bundle dumps ever show vld/vst spill pressure from the
    # (tb, half) live `arg`, strip-mine the body over 64-row chunks with
    # lax.fori_loop(unroll=True) instead of shrinking tb.


# ---------------------------------------------------------------------------
# Module wrapper (JAX / Pallas)
# ---------------------------------------------------------------------------
class SinusPositionEmbeddingPallas:
    def __init__(self, dim, out_dtype=jnp.float32):
        assert dim >= 4 and dim % 2 == 0, "dim must be even and >= 4"
        self.dim = dim
        self.half = dim // 2
        self.neg_emb = -(math.log(10000.0) / (self.half - 1))
        self.out_dtype = jnp.dtype(out_dtype)

    def __call__(self, x, scale=1000):
        # x: (B,) timesteps (any float/int dtype)
        x = jnp.asarray(x, jnp.float32).reshape(-1)
        b = int(x.shape[0])
        dim, half = self.dim, self.half
        out_bytes = self.out_dtype.itemsize

        # Row-tile selection:
        #  * multiple of 8 sublanes,
        #  * >= 2 grid steps when B > 8 (shards rows across v7x's 2 TCs),
        #  * capped at 2048 rows and ~4 MiB per output tile (VMEM headroom
        #    with double-buffering on v5e/v6e/v7x).
        rows8 = _round_up(b, 8)
        vmem_rows = max(8, ((4 * 1024 * 1024) // (dim * out_bytes)) // 8 * 8)
        if rows8 <= 8:
            tb = 8
        else:
            tb = max(8, _round_up(pl.cdiv(rows8, 2), 8))
        tb = min(tb, 2048, vmem_rows)
        grid = (pl.cdiv(b, tb),)  # partial last block handled by Pallas

        kernel = functools.partial(
            _sinus_kernel, scale=float(scale), neg_emb=self.neg_emb, half=half
        )

        cost = pl.CostEstimate(
            flops=2 * b * half,                       # two broadcast multiplies
            transcendentals=2 * b * half + half,      # sin + cos (+ freq exps)
            bytes_accessed=4 * b + b * dim * out_bytes,
        )

        out = pl.pallas_call(
            kernel,
            out_shape=jax.ShapeDtypeStruct((b, dim), self.out_dtype),
            grid_spec=pltpu.PrefetchScalarGridSpec(
                num_scalar_prefetch=0,
                grid=grid,
                in_specs=[pl.BlockSpec((tb, 1), lambda i: (i, 0))],
                out_specs=pl.BlockSpec((tb, dim), lambda i: (i, 0)),
            ),
            compiler_params=pltpu.CompilerParams(
                dimension_semantics=("parallel",),
                vmem_limit_bytes=32 * 1024 * 1024,
            ),
            cost_estimate=cost,
        )(x[:, None])
        return out  # (B, dim), written exactly once, no wrapper post-passes


# ---------------------------------------------------------------------------
# Pure-JAX reference (same math as the PyTorch module)
# ---------------------------------------------------------------------------
def _reference_sinus(x, dim, scale=1000):
    half = dim // 2
    emb = math.log(10000.0) / (half - 1)
    freqs = jnp.exp(jnp.arange(half, dtype=jnp.float32) * -emb)
    arg = (jnp.float32(scale) * x.astype(jnp.float32))[:, None] * freqs[None, :]
    return jnp.concatenate([jnp.sin(arg), jnp.cos(arg)], axis=-1)


if __name__ == "__main__":
    key = jax.random.PRNGKey(0)

    # Case 1: dim=256 (half=128, lane-aligned halves), B=16 -> 2 grid steps.
    # Case 2: dim=64  (half=32, unaligned halves / masked stores), B=6
    #         -> partial row block.
    for dim, b in ((256, 16), (64, 6)):
        key, sub = jax.random.split(key)
        x = jax.random.normal(sub, (b,), dtype=jnp.float32)

        module = SinusPositionEmbeddingPallas(dim)
        out = jax.block_until_ready(module(x, scale=1000))
        ref = _reference_sinus(x, dim, scale=1000)

        assert out.shape == (b, dim), out.shape
        np.testing.assert_allclose(
            np.asarray(out), np.asarray(ref), rtol=2e-3, atol=2e-3
        )

    print("KERNEL_OK")
</pallas_src>

<mosaic_0001>
module attributes {stable_mosaic.version = 11 : i64} {
  func.func @_sinus_kernel(%arg0: i32, %arg1: memref<8x1xf32, #tpu.memory_space<vmem>>, %arg2: memref<8x256xf32, #tpu.memory_space<vmem>>) attributes {dimension_semantics = [#tpu.dimension_semantics<parallel>], iteration_bounds = array<i64: 2>, scalar_prefetch = 0 : i64, scratch_operands = 0 : i64, tpu.core_type = #tpu.core_type<tc>, window_params = [{transform_indices = @transform_0, window_bounds = array<i64: 8, 1>}, {transform_indices = @transform_1, window_bounds = array<i64: 8, 256>}]} {
    %0 = tpu.iota {dimensions = array<i32: 1>} : vector<1x128xi32>
    %1 = arith.sitofp %0 : vector<1x128xi32> to vector<1x128xf32>
    %cst = arith.constant -0.0725223646 : f32
    %2 = vector.broadcast %cst : f32 to vector<1x128xf32>
    %3 = arith.mulf %1, %2 : vector<1x128xf32>
    %4 = math.exp %3 : vector<1x128xf32>
    %c0 = arith.constant 0 : index
    %c0_0 = arith.constant 0 : index
    %5 = vector.load %arg1[%c0, %c0_0] : memref<8x1xf32, #tpu.memory_space<vmem>>, vector<8x1xf32>
    %cst_1 = arith.constant 1.000000e+03 : f32
    %6 = vector.broadcast %cst_1 : f32 to vector<8x1xf32>
    %7 = arith.mulf %6, %5 : vector<8x1xf32>
    %8 = vector.broadcast %7 : vector<8x1xf32> to vector<8x128xf32>
    %9 = vector.broadcast %4 : vector<1x128xf32> to vector<8x128xf32>
    %10 = arith.mulf %8, %9 : vector<8x128xf32>
    %11 = math.sin %10 : vector<8x128xf32>
    %c0_2 = arith.constant 0 : index
    %c0_3 = arith.constant 0 : index
    %12 = vector.load %arg2[%c0_2, %c0_3] : memref<8x256xf32, #tpu.memory_space<vmem>>, vector<8x128xf32>
    tpu.vector_store %arg2[%c0_2, %c0_3], %11 {strides = array<i32>} : memref<8x256xf32, #tpu.memory_space<vmem>>, vector<8x128xf32>,
    %13 = math.cos %10 : vector<8x128xf32>
    %c0_4 = arith.constant 0 : index
    %c128 = arith.constant 128 : index
    %14 = vector.load %arg2[%c0_4, %c128] : memref<8x256xf32, #tpu.memory_space<vmem>>, vector<8x128xf32>
    tpu.vector_store %arg2[%c0_4, %c128], %13 {strides = array<i32>} : memref<8x256xf32, #tpu.memory_space<vmem>>, vector<8x128xf32>,
    return
  }
  func.func @transform_0(%arg0: i32) -> (i32, i32) {
    %c0_i32 = arith.constant 0 : i32
    %c0_i32_0 = arith.constant 0 : i32
    return %arg0, %c0_i32 : i32, i32
  }
  func.func @transform_1(%arg0: i32) -> (i32, i32) {
    %c0_i32 = arith.constant 0 : i32
    %c0_i32_0 = arith.constant 0 : i32
    return %arg0, %c0_i32 : i32, i32
  }
}

</mosaic_0001>

<bundles_post_ra>
// kernel: tpu_custom_call.1
= control target key start
LH: loop header
LB: loop body
LE: loop exit
PB: predicated region body
PF: predicated region fallthrough
CT: control target
= control target key end

     0   :  { %6 = vsyncpa [#allocation3], 0  ;;  %s690_s0 = inlined_call_operand.vmem [shape: f32[16,1], index: 0, kind: input, shape index: {}]   ;;  %s691_s1 = inlined_call_operand.hbm [shape: f32[16,256], index: 1, kind: output, shape index: {}]  }
   0x1   :  { %8 = vsyncpa [#allocation3 + $0x1], 0  ;;  %s566_s6 = smov 0   ;;  %s568_s7 = smov 0  }
   0x2   :  { %s570_s8 = smov 0   ;;  %s572_s9 = smov 0  }
   0x3 LB: > { %s587_s10 = sadd.s32 4294967295, %s546_s9   ;;  %s409_s11 = sadd.s32 4294967294, %s546_s9   ;;  %s546_s9 = sphi %s572_s9, %s697_s9   ;;  %s542_s8 = sphi %s570_s8, %s696_s8   ;;  %s538_s7 = sphi %s568_s7, %s695_s7   ;;  %s534_s6 = sphi %s566_s6, %s694_s6  }
   0x4   : > { %s591_s12 = sadd.s32 1, %s546_s9   ;;  %s47_s13 = sadd.s32 1, %s542_s8 }
   0x5   : > { %s44_s14 = ssub.s32 %s546_s9, %s591_s12  ;;  %p57_p0 = scmp.ne.s32.totalorder %s542_s8, %s538_s7 }
   0x6   : > { %p45_p1 = scmp.eq.s32.totalorder %s44_s14, 0  ;;  %p58_p2 = scmp.eq.s32.totalorder %s587_s10, 1 }
   0x7   : > { %p63_p3 = scmp.ne.s32.totalorder %s538_s7, %s534_s6  ;;  %p64_p4 = scmp.eq.s32.totalorder %s409_s11, 1 }
   0x8   : > { %s602_s15 = scalar_select %p45_p1, %s542_s8, %s47_s13  }
   0x9   : > { %p604_p5 = por %p58_p2, %p57_p0  ;;  %p608_p6 = por %p64_p4, %p63_p3 }
   0xa   : > { %p412_p7 = scmp.ge.s32.totalorder %s546_s9, 1  ;;  %p89_p8 = scmp.lt.s32.totalorder %s546_s9, 3 }
   0xc   : > { %p90_p9 = pnand %p412_p7, %p89_p8 }
   0xd   : > { %p108_p10 = scmp.lt.s32.totalorder (!%p90_p9), %s587_s10, 1  ;;  %s105_s23 = sand.u32 (!%p90_p9), 1, %s538_s7  }
   0xe   : > { %93 = sbr.rel (%p90_p9) target bundleno = 247 (0xf7), region = 24  ;;  %s413_s24 = sshll.u32 (!%p90_p9), %s105_s23, 4 }
   0xf   : > { %s428_s25 = sshll.u32 (!%p90_p9), %s587_s10, 8  ;;  %s107_s26 = scalar_lea.vmem (!%p90_p9), [#allocation2], %s413_s24 }
  0x10   : > { %s350_s27 = sshll.u32 (!%p90_p9), %s107_s26, 4  ;;  %s647_s30 = scalar_lea.hbm (!%p90_p9), %s691_s1, %s428_s25  ;;  %s649_s27 = int_to_ptr.vmem [resolvable:$true] %s350_s27 }
  0x11   : > { %s336_s2 = scalar_lea.sflag (!%p90_p9), [#allocation3], %s105_s23  ;;  %s486_s3 = scalar_lea.vmem (!%p90_p9), %s649_s27, 256 }
  0x12   : > { %p487_p11 = scmp.ne.s32.totalorder (!%p90_p9), %s649_s27, %s486_s3  ;;  %s555_s4 = smov (!%p90_p9), [#allocation2]  }
  0x13   : > { %v548_v0 = vmov 0   ;;  %s109_s18 = scalar_select %p108_p10, %s587_s10, 1  ;;  %v112_v3 = vlaneseq  ;;  %v549_v21 = vmov 683565275   ;;  %v550_v23 = vmov 2475754826  }
  0x14   : > { %479 = vset.pattern.permute.xlu0 %v548_v0  ;;  %v551_v26 = vmov 2131351028   ;;  %v552_v29 = vmov 2102212464   ;;  %v553_v32 = vmov 920167782   ;;  %p488_p12 = pnand %p487_p11, %p604_p5 }
  0x15   : > { %s414_s19 = sshll.u32 %s109_s18, 3  ;;  %v113_v4 = vand.u32 127, %v112_v3  ;;  %v554_v35 = vmov 1326507024   ;;  %s490_s5 = sshll.u32 %s555_s4, 4  ;;  %s491_s5 = int_to_ptr.vmem [resolvable:$false] %s490_s5 }
  0x16   : > { %s111_s22 = scalar_lea.vmem %s690_s0, %s414_s19  ;;  %p489_p13 = pneg %p488_p12 }
  0x17   : > { %v118_v1 = vld [vmem:[%s111_s22] sm:$0xff]  ;;  %v114_v5 = vcvt.s32.f32 %v113_v4  ;;  %s492_s10 = scalar_lea.vmem %s491_s5, 512  ;;  %p493_p0 = scmp.lt.s32.totalorder %s649_s27, %s491_s5 }
  0x18   : > { %v119_v2 = vmul.f32 1000.0, %v118_v1  ;;  %p494_p1 = scmp.lt.s32.totalorder %s492_s10, %s486_s3 }
  0x19   : > { %v115_v6 = vmul.f32 -0.072522365, %v114_v5 }
  0x1a   : > { %122 = vperm.xlu0 %479, %v119_v2   ;;  %p495_p2 = por %p494_p1, %p493_p0 }
  0x1b   : > { %v116_v7 = vmul.f32 1.442695, %v115_v6 }
  0x1c   : > { %p496_p3 = pnand %p495_p2, %p489_p13 }
  0x1d   : > { %480 = vpow2.f32 %v116_v7 }
  0x2a   : > { %v481_v8 = vpop.eup %480 }
  0x95   : > { %v123_v9 = vpop.permute.xlu0 %122 }
  0x96   : > { %v619_v10 = vmul.f32 %v481_v8, %v123_v9 }
  0x98   : > { %v129_v11 = vand.u32 2139095040, %v619_v10  ;;  %v126_v15 = vand.u32 2147483647, %v619_v10  ;;  %vm128_vm7 = vcmp.lt.s32.totalorder %v619_v10, 0  ;;  %vm218_vm15 = vweird.f32 %v619_v10 }
  0x9a   : > { %v130_v12 = vshrl.u32 %v129_v11, 23  ;;  %v133_v18 = vand.u32 8388607, %v126_v15  ;;  %vm127_vm8 = vcmp.le.f32.partialorder %v126_v15, 0.7853982 }
  0x9c   : > { %v415_v13 = vadd.s32 4294967169, %v130_v12  ;;  %v134_v37 = vor.u32 8388608, %v133_v18 }
  0x9e   : > { %v136_v14 = vadd.s32 1, %v415_v13  ;;  %v174_v51 = vshll.u32 %v134_v37, 8 }
  0xa0   : > { %vm137_vm0 = vcmp.gt.s32.totalorder %v136_v14, 0 }
  0xa1   : > { %v138_v16 = vsel %vm137_vm0, %v136_v14, 0 }
  0xa2   : > { %v140_v17 = vand.u32 31, %v138_v16  ;;  %v139_v20 = vshrl.u32 %v138_v16, 5 }
  0xa4   : > { %v141_v19 = vsub.s32 32, %v140_v17  ;;  %v143_v22 = vshll.u32 %v549_v21, %v140_v17  ;;  %v146_v24 = vshll.u32 %v550_v23, %v140_v17  ;;  %v149_v28 = vshll.u32 %v551_v26, %v140_v17 }
  0xa5   : > { %v152_v31 = vshll.u32 %v552_v29, %v140_v17  ;;  %v155_v34 = vshll.u32 %v553_v32, %v140_v17  ;;  %vm158_vm1 = vcmp.lt.s32.totalorder %v139_v20, 1  ;;  %vm161_vm2 = vcmp.lt.s32.totalorder %v139_v20, 4 }
  0xa6   : > { %v144_v25 = vshrl.u32 %v550_v23, %v141_v19  ;;  %v147_v27 = vshrl.u32 %v551_v26, %v141_v19  ;;  %v150_v30 = vshrl.u32 %v552_v29, %v141_v19  ;;  %v153_v33 = vshrl.u32 %v553_v32, %v141_v19 }
  0xa7   : > { %v156_v36 = vshrl.u32 %v554_v35, %v141_v19  ;;  %v142_v46 = vshrl.u32 %v549_v21, %v141_v19  ;;  %vm160_vm3 = vcmp.lt.s32.totalorder %v139_v20, 3  ;;  %vm159_vm4 = vcmp.lt.s32.totalorder %v139_v20, 2 }
  0xa8   : > { %v145_v38 = vor.u32 %v144_v25, %v143_v22  ;;  %v148_v39 = vor.u32 %v147_v27, %v146_v24  ;;  %v151_v40 = vor.u32 %v150_v30, %v149_v28  ;;  %v154_v41 = vor.u32 %v153_v33, %v152_v31 }
  0xa9   : > { %v157_v42 = vor.u32 %v156_v36, %v155_v34 }
  0xaa   : > { %v163_v43 = vsel %vm161_vm2, %v151_v40, 2102212464  ;;  %v166_v44 = vsel %vm158_vm1, %v145_v38, %v148_v39  ;;  %v170_v45 = vsel %vm158_vm1, %v148_v39, %v151_v40  ;;  %v167_v47 = vsel %vm161_vm2, %v154_v41, 920167782 }
  0xab   : > { %v171_v48 = vsel %vm161_vm2, %v157_v42, 1326507024  ;;  %v168_v49 = vsel %vm160_vm3, %v151_v40, %v167_v47  ;;  %v162_v52 = vsel %vm158_vm1, %v142_v46, %v145_v38  ;;  %v164_v53 = vsel %vm160_vm3, %v148_v39, %v163_v43 }
  0xac   : > { %v172_v50 = vsel %vm160_vm3, %v154_v41, %v171_v48  ;;  %v169_v54 = vsel %vm159_vm4, %v166_v44, %v168_v49  ;;  %v165_v60 = vsel %vm159_vm4, %v162_v52, %v164_v53 }
  0xad   : > { %v173_v55 = vsel %vm159_vm4, %v170_v45, %v172_v50  ;;  %v628_v58 = vmul.u32.u64.low %v174_v51, %v169_v54  ;;  %v629_v59 = vmul.u32.u64.high %v174_v51, %v169_v54, %v628_v58  ;;  %v181_v62 = vmul.u32 %v174_v51, %v165_v60 }
  0xae   : > { %v625_v56 = vmul.u32.u64.low %v174_v51, %v173_v55  ;;  %v626_v57 = vmul.u32.u64.high %v174_v51, %v173_v55, %v625_v56 }
  0xaf   : > { %v184_v61 = vadd.s32 1, %v629_v59 }
  0xb0   : > { %vm183_vm5 = vc.u32 %v626_v57, %v628_v58  ;;  %v182_v11 = vadd.s32 %v628_v58, %v626_v57 }
  0xb1   : > { %v185_v63 = vsel %vm183_vm5, %v184_v61, %v629_v59 }
  0xb2   : > { %v186_v0 = vadd.s32 %v185_v63, %v181_v62 }
  0xb4   : > { %v187_v1 = vadd.s32 536870912, %v186_v0 }
  0xb6   : > { %v188_v2 = vshrl.u32 %v187_v1, 30 }
  0xb8   : > { %v189_v3 = vshll.u32 %v188_v2, 30  ;;  %v212_v25 = vsub.s32 4, %v188_v2 }
  0xba   : > { %v190_v4 = vsub.s32 %v186_v0, %v189_v3  ;;  %v213_v28 = vsel %vm128_vm7, %v212_v25, %v188_v2 }
  0xbb   : > { %v215_v29 = vsel %vm127_vm8, 0, %v213_v28 }
  0xbc   : > { %v192_v5 = vsub.s32 0, %v190_v4  ;;  %v219_v30 = vadd.s32 3, %v215_v29  ;;  %v324_v32 = vand.u32 3, %v215_v29 }
  0xbe   : > { %v416_v6 = vmin.u32 %v192_v5, %v190_v4  ;;  %v220_v31 = vand.u32 3, %v219_v30  ;;  %vm329_vm10 = vcmp.eq.s32.totalorder %v324_v32, 2  ;;  %vm326_vm12 = vcmp.eq.s32.totalorder %v324_v32, 0 }
  0xbf   : > { %vm325_vm14 = vcmp.lt.s32.totalorder %v324_v32, 2 }
  0xc0   : > { %v194_v7 = vclz %v416_v6  ;;  %vm225_vm9 = vcmp.eq.s32.totalorder %v220_v31, 2  ;;  %vm222_vm11 = vcmp.eq.s32.totalorder %v220_v31, 0  ;;  %vm221_vm13 = vcmp.lt.s32.totalorder %v220_v31, 2 }
  0xc2   : > { %v417_v8 = vadd.s32 4294967294, %v194_v7 }
  0xc4   : > { %vm418_vm6 = vcmp.lt.s32.totalorder %v417_v8, 0 }
  0xc5   : > { %v197_v9 = vsel %vm418_vm6, 0, %v417_v8 }
  0xc6   : > { %v198_v12 = vsub.s32 32, %v197_v9  ;;  %v202_v13 = vsub.s32 4294967266, %v197_v9  ;;  %v199_v14 = vshll.u32 %v190_v4, %v197_v9 }
  0xc8   : > { %v200_v16 = vshrl.u32 %v182_v11, %v198_v12  ;;  %v203_v17 = vadd.s32 127, %v202_v13 }
  0xca   : > { %v201_v18 = vor.u32 %v200_v16, %v199_v14  ;;  %v204_v19 = vshll.u32 %v203_v17, 23 }
  0xcc   : > { %v205_v20 = vor.u32 4788187, %v204_v19  ;;  %v208_v22 = vcvt.s32.f32 %v201_v18 }
  0xce   : > { %v206_v21 = vand.u32 2147483647, %v205_v20 }
  0xd0   : > { %v209_v23 = vmul.f32 %v208_v22, %v206_v21 }
  0xd2   : > { %v210_v24 = vxor.u32 2147483648, %v209_v23 }
  0xd4   : > { %v211_v26 = vsel %vm128_vm7, %v210_v24, %v209_v23 }
  0xd5   : > { %v214_v27 = vsel %vm127_vm8, %v619_v10, %v211_v26 }
  0xd6   : > { %482 = vcosq.f32 %v214_v27 }
  0xd7   : > { %484 = vsinq.f32 %v214_v27 }
  0xe3   : > { %v483_v33 = vpop.eup %482 }
  0xe4   : > { %v485_v34 = vpop.eup %484  ;;  %v226_v35 = vxor.u32 2147483648, %v483_v33 }
  0xe5   : > { %v223_v36 = vxor.u32 2147483648, %v485_v34 }
  0xe6   : > { %v227_v15 = vsel %vm225_vm9, %v226_v35, %v485_v34  ;;  %v331_v37 = vsel %vm329_vm10, %v226_v35, %v485_v34 }
  0xe7   : > { %v224_v38 = vsel %vm222_vm11, %v483_v33, %v223_v36  ;;  %v328_v39 = vsel %vm326_vm12, %v483_v33, %v223_v36 }
  0xe8   : > { %v228_v40 = vsel %vm221_vm13, %v224_v38, %v227_v15  ;;  %v332_v41 = vsel %vm325_vm14, %v328_v39, %v331_v37 }
  0xe9   : > { %v229_v42 = vsel %vm218_vm15, nan, %v228_v40  ;;  %v333_v43 = vsel %vm218_vm15, nan, %v332_v41 }
  0xea   : > { %230 = vst [vmem:[%s107_s26] sm:$0xff] %v229_v42  ;;  %334 = vst [vmem:[%s107_s26 + $0x8] sm:$0xff] %v333_v43 }
  0xeb   : > { %499 = shalt.err (!%p496_p3)
}
  0xec   : > { %s500_s11 = scalar_lea.hbm %s647_s30, 256  ;;  %s504_s18 = scalar_lea.hbm %s691_s1, 512 }
  0xed   : > { %p501_p4 = scmp.ne.s32.totalorder %s647_s30, %s500_s11  ;;  %p505_p9 = scmp.lt.s32.totalorder %s647_s30, %s691_s1 }
  0xee   : > { %p506_p10 = scmp.lt.s32.totalorder %s504_s18, %s500_s11 }
  0xef   : > { %p502_p7 = pnand %p501_p4, %p604_p5 }
  0xf0   : > { %p507_p11 = por %p506_p10, %p505_p9 }
  0xf1   : > { %p503_p8 = pneg %p502_p7 }
  0xf3   : > { %p508_p12 = pnand %p507_p11, %p503_p8 }
  0xf5   : > { %511 = shalt.err (!%p508_p12)
}
  0xf6   : > { %433 = dma.vmem_to_hbm [thread:$0]  (%p604_p5), %s649_s27, 256, %s647_s30, %s336_s2  }
  0xf7 PF: > { %p439_p13 = scmp.ge.s32.totalorder %s546_s9, 2  ;;  %s362_s21 = sand.u32 1, %s534_s6  }
  0xf8   : > { %s363_s22 = scalar_lea.sflag [#allocation3], %s362_s21 }
  0xf9   : > { %p436_p0 = pnand %p439_p13, %p608_p6 }
  0xfb   : > { %p437_p1 = pneg %p436_p0 }
  0xfd   : > { %529 = dma.done.wait (%p437_p1), %s363_s22, 256  }
  0xfe   : > { %531 = vsyncadd (%p437_p1), %s363_s22, 4294967040  ;;  %p11_p2 = scmp.ge.s32.totalorder %s591_s12, 4   ;;  %s694_s6 = smov %s538_s7 }
  0xff   : > { %s695_s7 = smov %s542_s8  ;;  %s696_s8 = smov %s602_s15 }
 0x100   : > { %s697_s9 = smov %s591_s12  ;;  %13 = sbr.rel (!%p11_p2) target bundleno = 3 (0x3), region = 59 }
 0x105   :  { %368 = vsyncpa [#allocation3], 1 }
 0x106   :  { %370 = vsyncpa [#allocation3 + $0x1], 1 }

</bundles_post_ra>
